<compile_context>
chip_gen: v6e
topology: v6e:2x2x1
jax: 0.10.0
libtpu: 0.0.40
codegen_flags: <defaults>
</compile_context>

<pallas_src>
import functools

import jax
import jax.numpy as jnp
from jax.experimental import pallas as pl
from jax.experimental.pallas import tpu as pltpu


# ----------------------------------------------------------------------------
# Fused Pallas kernel: whole MLP in one invocation
# ----------------------------------------------------------------------------
def _mlp_kernel(*refs, n_layers: int):
    # refs = (x_ref, w0, b0, w1, b1, ..., w{L-1}, b{L-1}, o_ref)
    x_ref = refs[0]
    o_ref = refs[-1]
    wb = refs[1:-1]

    x = x_ref[...]  # (B, Din) f32
    for i in range(n_layers):
        w = wb[2 * i][...]       # (Din_i, Dout_i)
        b = wb[2 * i + 1][...]   # (1, Dout_i)
        x = jnp.dot(x, w, preferred_element_type=jnp.float32) + b
        if i != n_layers - 1:    # final Linear has no ReLU
            x = jnp.maximum(x, 0.0)
    o_ref[...] = x.astype(o_ref.dtype)


def encoder_forward(params, x):
    """x: (batch, dim1*dim2) -> (batch, encoded_space_dim). Single pallas_call."""
    n = len(params)
    flat = []
    for w, b in params:
        flat.append(w)
        flat.append(b)

    B = x.shape[0]
    Dout = params[-1][0].shape[1]

    # No grid: single full-array block, everything resident in VMEM.
    vmem_spec = pl.BlockSpec(memory_space=pltpu.MemorySpace.VMEM)
    return pl.pallas_call(
        functools.partial(_mlp_kernel, n_layers=n),
        out_shape=jax.ShapeDtypeStruct((B, Dout), x.dtype),
        in_specs=[vmem_spec] * (1 + 2 * n),
        out_specs=vmem_spec,
    )(x, *flat)


# ----------------------------------------------------------------------------
# Parameter construction (mirrors the nn.Linear shapes of the PyTorch module)
# ----------------------------------------------------------------------------
def init_encoder_params(key, encoded_space_dim, dim1, dim2, num_layers, num_neur):
    """Returns [(W, b)] with W already transposed to (in, out) and b as (1, out)."""
    dims = [dim1 * dim2] + [num_neur] * (num_layers + 1) + [encoded_space_dim]
    params = []
    for i in range(len(dims) - 1):
        fan_in, fan_out = dims[i], dims[i + 1]
        key, kw, kb = jax.random.split(key, 3)
        bound = 1.0 / jnp.sqrt(fan_in)  # PyTorch default uniform bound
        w = jax.random.uniform(kw, (fan_in, fan_out), jnp.float32, -bound, bound)
        b = jax.random.uniform(kb, (1, fan_out), jnp.float32, -bound, bound)
        params.append((w, b))
    return params


def encoder_forward_ref(params, x):
    """Pure-JAX reference for correctness checking."""
    n = len(params)
    for i, (w, b) in enumerate(params):
        x = x @ w + b
        if i != n - 1:
            x = jnp.maximum(x, 0.0)
    return x


# ----------------------------------------------------------------------------
# Main
# ----------------------------------------------------------------------------
if __name__ == "__main__":
    # Small shapes consistent with the module's forward.
    batch = 8
    dim1, dim2 = 16, 16          # input features = dim1 * dim2 = 256
    num_neur = 32
    num_layers = 2
    encoded_space_dim = 8

    key = jax.random.PRNGKey(0)
    key_params, key_x = jax.random.split(key)

    params = init_encoder_params(
        key_params, encoded_space_dim, dim1, dim2, num_layers, num_neur)

    # Input already flattened, as the PyTorch forward expects (B, dim1*dim2).
    x = jax.random.normal(key_x, (batch, dim1 * dim2), jnp.float32)

    fwd = jax.jit(encoder_forward)
    out = jax.block_until_ready(fwd(params, x))

    # Correctness check against the pure-JAX reference.
    ref = jax.block_until_ready(encoder_forward_ref(params, x))
    assert out.shape == (batch, encoded_space_dim), out.shape
    assert jnp.allclose(out, ref, atol=1e-5, rtol=1e-5), "mismatch vs reference"

    print("KERNEL_OK")
</pallas_src>

<mosaic_0001>
module attributes {stable_mosaic.version = 11 : i64} {
  func.func @_mlp_kernel(%arg0: memref<8x256xf32, #tpu.memory_space<vmem>>, %arg1: memref<256x32xf32, #tpu.memory_space<vmem>>, %arg2: memref<1x32xf32, #tpu.memory_space<vmem>>, %arg3: memref<32x32xf32, #tpu.memory_space<vmem>>, %arg4: memref<1x32xf32, #tpu.memory_space<vmem>>, %arg5: memref<32x32xf32, #tpu.memory_space<vmem>>, %arg6: memref<1x32xf32, #tpu.memory_space<vmem>>, %arg7: memref<32x8xf32, #tpu.memory_space<vmem>>, %arg8: memref<1x8xf32, #tpu.memory_space<vmem>>, %arg9: memref<8x8xf32, #tpu.memory_space<vmem>>) attributes {dimension_semantics = [], scalar_prefetch = 0 : i64, scratch_operands = 0 : i64, tpu.core_type = #tpu.core_type<tc>} {
    %c0 = arith.constant 0 : index
    %c0_0 = arith.constant 0 : index
    %0 = vector.load %arg0[%c0, %c0_0] : memref<8x256xf32, #tpu.memory_space<vmem>>, vector<8x256xf32>
    %c0_1 = arith.constant 0 : index
    %c0_2 = arith.constant 0 : index
    %1 = vector.load %arg1[%c0_1, %c0_2] : memref<256x32xf32, #tpu.memory_space<vmem>>, vector<256x32xf32>
    %c0_3 = arith.constant 0 : index
    %c0_4 = arith.constant 0 : index
    %2 = vector.load %arg2[%c0_3, %c0_4] : memref<1x32xf32, #tpu.memory_space<vmem>>, vector<1x32xf32>
    %cst = arith.constant dense<0.000000e+00> : vector<8x32xf32>
    %3 = tpu.matmul %0, %1, %cst {dimension_numbers = #tpu.dot_dimension_numbers<[1], [0], [0], [1], [0, 0, 1, 1], [], []>} : vector<8x256xf32>, vector<256x32xf32>, vector<8x32xf32> -> vector<8x32xf32>
    %4 = vector.broadcast %2 : vector<1x32xf32> to vector<8x32xf32>
    %5 = arith.addf %3, %4 : vector<8x32xf32>
    %cst_5 = arith.constant 0.000000e+00 : f32
    %6 = vector.broadcast %cst_5 : f32 to vector<8x32xf32>
    %7 = arith.maximumf %5, %6 : vector<8x32xf32>
    %c0_6 = arith.constant 0 : index
    %c0_7 = arith.constant 0 : index
    %8 = vector.load %arg3[%c0_6, %c0_7] : memref<32x32xf32, #tpu.memory_space<vmem>>, vector<32x32xf32>
    %c0_8 = arith.constant 0 : index
    %c0_9 = arith.constant 0 : index
    %9 = vector.load %arg4[%c0_8, %c0_9] : memref<1x32xf32, #tpu.memory_space<vmem>>, vector<1x32xf32>
    %cst_10 = arith.constant dense<0.000000e+00> : vector<8x32xf32>
    %10 = tpu.matmul %7, %8, %cst_10 {dimension_numbers = #tpu.dot_dimension_numbers<[1], [0], [0], [1], [0, 0, 1, 1], [], []>} : vector<8x32xf32>, vector<32x32xf32>, vector<8x32xf32> -> vector<8x32xf32>
    %11 = vector.broadcast %9 : vector<1x32xf32> to vector<8x32xf32>
    %12 = arith.addf %10, %11 : vector<8x32xf32>
    %cst_11 = arith.constant 0.000000e+00 : f32
    %13 = vector.broadcast %cst_11 : f32 to vector<8x32xf32>
    %14 = arith.maximumf %12, %13 : vector<8x32xf32>
    %c0_12 = arith.constant 0 : index
    %c0_13 = arith.constant 0 : index
    %15 = vector.load %arg5[%c0_12, %c0_13] : memref<32x32xf32, #tpu.memory_space<vmem>>, vector<32x32xf32>
    %c0_14 = arith.constant 0 : index
    %c0_15 = arith.constant 0 : index
    %16 = vector.load %arg6[%c0_14, %c0_15] : memref<1x32xf32, #tpu.memory_space<vmem>>, vector<1x32xf32>
    %cst_16 = arith.constant dense<0.000000e+00> : vector<8x32xf32>
    %17 = tpu.matmul %14, %15, %cst_16 {dimension_numbers = #tpu.dot_dimension_numbers<[1], [0], [0], [1], [0, 0, 1, 1], [], []>} : vector<8x32xf32>, vector<32x32xf32>, vector<8x32xf32> -> vector<8x32xf32>
    %18 = vector.broadcast %16 : vector<1x32xf32> to vector<8x32xf32>
    %19 = arith.addf %17, %18 : vector<8x32xf32>
    %cst_17 = arith.constant 0.000000e+00 : f32
    %20 = vector.broadcast %cst_17 : f32 to vector<8x32xf32>
    %21 = arith.maximumf %19, %20 : vector<8x32xf32>
    %c0_18 = arith.constant 0 : index
    %c0_19 = arith.constant 0 : index
    %22 = vector.load %arg7[%c0_18, %c0_19] : memref<32x8xf32, #tpu.memory_space<vmem>>, vector<32x8xf32>
    %c0_20 = arith.constant 0 : index
    %c0_21 = arith.constant 0 : index
    %23 = vector.load %arg8[%c0_20, %c0_21] : memref<1x8xf32, #tpu.memory_space<vmem>>, vector<1x8xf32>
    %cst_22 = arith.constant dense<0.000000e+00> : vector<8x8xf32>
    %24 = tpu.matmul %21, %22, %cst_22 {dimension_numbers = #tpu.dot_dimension_numbers<[1], [0], [0], [1], [0, 0, 1, 1], [], []>} : vector<8x32xf32>, vector<32x8xf32>, vector<8x8xf32> -> vector<8x8xf32>
    %25 = vector.broadcast %23 : vector<1x8xf32> to vector<8x8xf32>
    %26 = arith.addf %24, %25 : vector<8x8xf32>
    %c0_23 = arith.constant 0 : index
    %c0_24 = arith.constant 0 : index
    %27 = vector.load %arg9[%c0_23, %c0_24] : memref<8x8xf32, #tpu.memory_space<vmem>>, vector<8x8xf32>
    tpu.vector_store %arg9[%c0_23, %c0_24], %26 {strides = array<i32>} : memref<8x8xf32, #tpu.memory_space<vmem>>, vector<8x8xf32>,
    return
  }
}

</mosaic_0001>

<bundles_post_ra>
// kernel: encoder_forward.1
= control target key start
LH: loop header
LB: loop body
LE: loop exit
PB: predicated region body
PF: predicated region fallthrough
CT: control target
= control target key end

     0   :  { %s743_s0 = inlined_call_operand.vmem [shape: f32[8,256], index: 0, kind: input, shape index: {}]   ;;  %s744_s1 = inlined_call_operand.vmem [shape: f32[256,32], index: 1, kind: input, shape index: {}]   ;;  %s745_s2 = inlined_call_operand.vmem [shape: f32[1,32], index: 2, kind: input, shape index: {}]   ;;  %s746_s3 = inlined_call_operand.vmem [shape: f32[32,32], index: 3, kind: input, shape index: {}]   ;;  %s747_s4 = inlined_call_operand.vmem [shape: f32[1,32], index: 4, kind: input, shape index: {}]   ;;  %s748_s5 = inlined_call_operand.vmem [shape: f32[32,32], index: 5, kind: input, shape index: {}]   ;;  %s749_s6 = inlined_call_operand.vmem [shape: f32[1,32], index: 6, kind: input, shape index: {}]   ;;  %s750_s7 = inlined_call_operand.vmem [shape: f32[32,8], index: 7, kind: input, shape index: {}]   ;;  %s751_s8 = inlined_call_operand.vmem [shape: f32[1,8], index: 8, kind: input, shape index: {}]   ;;  %s752_s9 = inlined_call_operand.hbm [shape: f32[8,8], index: 9, kind: output, shape index: {}]  }
   0x1   :  { %v66_v0 = vld [vmem:[%s744_s1 + $0xf8] sm:$0xff]  ;;  %v65_v2 = vld [vmem:[%s744_s1 + $0xf0] sm:$0xff]  ;;  %v64_v4 = vld [vmem:[%s744_s1 + $0xe8] sm:$0xff] }
   0x2   :  { %v50_v1 = vld [vmem:[%s744_s1 + $0x78] sm:$0xff]  ;;  %423 = vmatprep.subr.mxu0 %v66_v0  ;;  %v49_v3 = vld [vmem:[%s744_s1 + $0x70] sm:$0xff]  ;;  %v48_v5 = vld [vmem:[%s744_s1 + $0x68] sm:$0xff] }
   0x3   :  { %424 = vmatpush3.msra.mxu0 %v50_v1  ;;  %v63_v6 = vld [vmem:[%s744_s1 + $0xe0] sm:$0xff]  ;;  %v62_v8 = vld [vmem:[%s744_s1 + $0xd8] sm:$0xff]  ;;  %v61_v10 = vld [vmem:[%s744_s1 + $0xd0] sm:$0xff] }
   0x4   :  { %425 = vmatprep.subr.mxu0 %v65_v2  ;;  %v47_v7 = vld [vmem:[%s744_s1 + $0x60] sm:$0xff]  ;;  %v46_v9 = vld [vmem:[%s744_s1 + $0x58] sm:$0xff]  ;;  %v45_v11 = vld [vmem:[%s744_s1 + $0x50] sm:$0xff] }
   0x5   :  { %426 = vmatpush3.msra.mxu0 %v49_v3  ;;  %v60_v12 = vld [vmem:[%s744_s1 + $0xc8] sm:$0xff] }
   0x6   :  { %427 = vmatprep.subr.mxu0 %v64_v4  ;;  %v34_v13 = vld [vmem:[%s743_s0 + $0x8] sm:$0xff] }
   0x7   :  { %428 = vmatpush3.msra.mxu0 %v48_v5  ;;  %v44_v14 = vld [vmem:[%s744_s1 + $0x48] sm:$0xff]  ;;  %138 = vmatprep.mubr.f32.mxu0 %v34_v13 }
   0x8   :  { %429 = vmatprep.subr.mxu0 %v63_v6 }
   0x9   :  { %430 = vmatpush3.msra.mxu0 %v47_v7 }
   0xa   :  { %431 = vmatprep.subr.mxu0 %v62_v8 }
   0xb   :  { %432 = vmatpush3.msra.mxu0 %v46_v9 }
   0xc   :  { %433 = vmatprep.subr.mxu0 %v61_v10 }
   0xd   :  { %14 = vsyncpa [#allocation3], 0  ;;  %434 = vmatpush3.msra.mxu0 %v45_v11  ;;  %v59_v15 = vld [vmem:[%s744_s1 + $0xc0] sm:$0xff]  ;;  %v58_v17 = vld [vmem:[%s744_s1 + $0xb8] sm:$0xff]  ;;  %v531_v34 = vmov 0.0   ;;  %vm532_vm0 = vmmov 0  }
   0xe   :  { %435 = vmatprep.subr.mxu0 %v60_v12  ;;  %v43_v16 = vld [vmem:[%s744_s1 + $0x40] sm:$0xff]  ;;  %v42_v18 = vld [vmem:[%s744_s1 + $0x38] sm:$0xff]  ;;  %v57_v19 = vld [vmem:[%s744_s1 + $0xb0] sm:$0xff]  ;;  %473 = vmatprep.subr.mxu1 %v531_v34  ;;  %vm156_vm1 = vcmask 261120   ;;  %s533_s18 = smov [#allocation2]   ;;  %vm400_vm2 = vcmask 64512  }
   0xf   :  { %436 = vmatpush3.msra.mxu0 %v44_v14  ;;  %v41_v20 = vld [vmem:[%s744_s1 + $0x30] sm:$0xff]  ;;  %v56_v21 = vld [vmem:[%s744_s1 + $0xa8] sm:$0xff]  ;;  %v55_v23 = vld [vmem:[%s744_s1 + $0xa0] sm:$0xff]  ;;  %481 = vmatprep.mubr.msk.f32.mxu1 %vm532_vm0, %v531_v34 }
  0x10   :  { %437 = vmatprep.subr.mxu0 %v59_v15  ;;  %v40_v22 = vld [vmem:[%s744_s1 + $0x28] sm:$0xff]  ;;  %v39_v24 = vld [vmem:[%s744_s1 + $0x20] sm:$0xff]  ;;  %v54_v25 = vld [vmem:[%s744_s1 + $0x98] sm:$0xff] }
  0x11   :  { %438 = vmatpush3.msra.mxu0 %v43_v16  ;;  %v38_v26 = vld [vmem:[%s744_s1 + $0x18] sm:$0xff]  ;;  %v53_v27 = vld [vmem:[%s744_s1 + $0x90] sm:$0xff]  ;;  %v52_v29 = vld [vmem:[%s744_s1 + $0x88] sm:$0xff] }
  0x12   :  { %439 = vmatprep.subr.mxu0 %v58_v17  ;;  %v37_v28 = vld [vmem:[%s744_s1 + $0x10] sm:$0xff]  ;;  %v36_v30 = vld [vmem:[%s744_s1 + $0x8] sm:$0xff]  ;;  %v51_v31 = vld [vmem:[%s744_s1 + $0x80] sm:$0xff] }
  0x13   :  { %440 = vmatpush3.msra.mxu0 %v42_v18  ;;  %v35_v32 = vld [vmem:[%s744_s1] sm:$0xff]  ;;  %v148_v35 = vld [vmem:[%s746_s3 + $0x18] sm:$0xff]  ;;  %v147_v36 = vld [vmem:[%s746_s3 + $0x10] sm:$0xff] }
  0x14   :  { %441 = vmatprep.subr.mxu0 %v57_v19  ;;  %v33_v33 = vld [vmem:[%s743_s0] sm:$0xff]  ;;  %474 = vmatpush3.msra.mxu1 %v148_v35  ;;  %v146_v37 = vld [vmem:[%s746_s3 + $0x8] sm:$0xff]  ;;  %v234_v45 = vld [vmem:[%s748_s5 + $0x18] sm:$0xff]  ;;  %s408_s0 = sshll.u32 %s533_s18, 4  ;;  %s409_s0 = int_to_ptr.vmem [resolvable:$true] %s408_s0 }
  0x15   :  { %442 = vmatpush3.msra.mxu0 %v41_v20  ;;  %475 = vmatprep.subr.mxu1 %v531_v34  ;;  %v145_v38 = vld [vmem:[%s746_s3] sm:$0xff]  ;;  %v233_v46 = vld [vmem:[%s748_s5 + $0x10] sm:$0xff]  ;;  %v232_v47 = vld [vmem:[%s748_s5 + $0x8] sm:$0xff]  ;;  %p514_p1 = scmp.lt.s32.totalorder %s409_s0, %s409_s0 }
  0x16   :  { %443 = vmatprep.subr.mxu0 %v56_v21  ;;  %476 = vmatpush3.msra.mxu1 %v147_v36  ;;  %v416_v40 = vld [vmem:[%s745_s2] ss:$0 sm:$0xff]  ;;  %v319_v54 = vld [vmem:[%s750_s7 + $0x18] sm:$0xff]  ;;  %v318_v55 = vld [vmem:[%s750_s7 + $0x10] sm:$0xff] }
  0x17   :  { %444 = vmatpush3.msra.mxu0 %v40_v22  ;;  %477 = vmatprep.subr.mxu1 %v531_v34  ;;  %v231_v48 = vld [vmem:[%s748_s5] sm:$0xff]  ;;  %v317_v56 = vld [vmem:[%s750_s7 + $0x8] sm:$0xff] }
  0x18   :  { %445 = vmatprep.subr.mxu0 %v55_v23  ;;  %478 = vmatpush3.msra.mxu1 %v146_v37  ;;  %v417_v49 = vld [vmem:[%s747_s4] ss:$0 sm:$0xff] }
  0x19   :  { %446 = vmatpush3.msra.mxu0 %v39_v24  ;;  %479 = vmatprep.subr.mxu1 %v531_v34  ;;  %v316_v57 = vld [vmem:[%s750_s7] sm:$0xff]  ;;  %s509_s7 = scalar_lea.vmem %s409_s0, 128 }
  0x1a   :  { %447 = vmatprep.subr.mxu0 %v54_v25  ;;  %480 = vmatpush3.msra.mxu1 %v145_v38  ;;  %v419_v58 = vld [vmem:[%s749_s6] ss:$0 sm:$0xff]  ;;  %p510_p0 = scmp.ne.s32.totalorder %s409_s0, %s509_s7  ;;  %p515_p2 = scmp.lt.s32.totalorder %s509_s7, %s509_s7 }
  0x1b   :  { %448 = vmatpush3.msra.mxu0 %v38_v26  ;;  %484 = vmatprep.subr.mxu1 %v531_v34  ;;  %v421_v63 = vld [vmem:[%s751_s8] ss:$0 sm:$0xff] }
  0x1c   :  { %449 = vmatprep.subr.mxu0 %v53_v27  ;;  %p516_p3 = por %p515_p2, %p514_p1 }
  0x1d   :  { %450 = vmatpush3.msra.mxu0 %v37_v28 }
  0x1e   :  { %451 = vmatprep.subr.mxu0 %v52_v29  ;;  %p517_p4 = pnand %p516_p3, %p510_p0 }
  0x1f   :  { %452 = vmatpush3.msra.mxu0 %v36_v30 }
  0x20   :  { %453 = vmatprep.subr.mxu0 %v51_v31 }
  0x21   :  { %454 = vmatpush3.msra.mxu0 %v35_v32 }
  0x22   :  { %139 = vmatmul.mubr.f32.vlgmr.msra.gmra.mxu0 %v33_v33 }
  0xe2   :  { %v455_v39 = vpop.f32.mrf.mxu0 }
  0xe4   :  { %v456_v41 = vpop.f32.mrf.mxu0 }
  0xe5   :  { %v457_v42 = vadd.f32 %v456_v41, %v455_v39 }
  0xe7   :  { %v141_v43 = vadd.f32 %v457_v42, %v416_v40 }
  0xe9   :  { %v144_v44 = vmax.f32 %v141_v43, 0.0 }
  0xeb   :  { %482 = vmatmul.mubr.msk.f32.vlgmr.msra.gmra.mxu1 %vm156_vm1, %v144_v44 }
  0xec   :  { %485 = vmatpush3.msra.mxu1 %v234_v45  ;;  %492 = vmatprep.mubr.msk.f32.mxu1 %vm532_vm0, %v531_v34 }
  0xed   :  { %486 = vmatprep.subr.mxu1 %v531_v34 }
  0xee   :  { %487 = vmatpush3.msra.mxu1 %v233_v46 }
  0xef   :  { %488 = vmatprep.subr.mxu1 %v531_v34 }
  0xf0   :  { %489 = vmatpush3.msra.mxu1 %v232_v47 }
  0xf1   :  { %490 = vmatprep.subr.mxu1 %v531_v34 }
  0xf2   :  { %491 = vmatpush3.msra.mxu1 %v231_v48 }
  0xf3   :  { %495 = vmatprep.subr.mxu1 %v531_v34 }
 0x1ab   :  { %v226_v50 = vpop.f32.mrf.mxu1 }
 0x1ac   :  { %v227_v51 = vadd.f32 %v417_v49, %v226_v50 }
 0x1ad   :  { %v483_v52 = vpop.f32.mrf.mxu1 }
 0x1ae   :  { %v230_v53 = vmax.f32 %v227_v51, 0.0 }
 0x1b0   :  { %493 = vmatmul.mubr.msk.f32.vlgmr.msra.gmra.mxu1 %vm156_vm1, %v230_v53 }
 0x1b1   :  { %496 = vmatpush3.msra.mxu1 %v319_v54  ;;  %503 = vmatprep.mubr.msk.f32.mxu1 %vm532_vm0, %v531_v34 }
 0x1b2   :  { %497 = vmatprep.subr.mxu1 %v531_v34 }
 0x1b3   :  { %498 = vmatpush3.msra.mxu1 %v318_v55 }
 0x1b4   :  { %499 = vmatprep.subr.mxu1 %v531_v34 }
 0x1b5   :  { %500 = vmatpush3.msra.mxu1 %v317_v56 }
 0x1b6   :  { %501 = vmatprep.subr.mxu1 %v531_v34 }
 0x1b7   :  { %502 = vmatpush3.msra.mxu1 %v316_v57 }
 0x270   :  { %v311_v59 = vpop.f32.mrf.mxu1 }
 0x271   :  { %v312_v60 = vadd.f32 %v419_v58, %v311_v59 }
 0x272   :  { %v494_v61 = vpop.f32.mrf.mxu1 }
 0x273   :  { %v315_v62 = vmax.f32 %v312_v60, 0.0 }
 0x275   :  { %504 = vmatmul.mubr.msk.f32.vlgmr.msra.gmra.mxu1 %vm156_vm1, %v315_v62 }
 0x335   :  { %v396_v0 = vpop.f32.mrf.mxu1 }
 0x336   :  { %v397_v1 = vadd.f32 %v421_v63, %v396_v0 }
 0x337   :  { %v505_v2 = vpop.f32.mrf.mxu1 }
 0x338   :  { %401 = vst.msk [vmem:[#allocation2] sm:$0xff] %vm400_vm2, %v397_v1 }
 0x339   :  { %520 = shalt.err (!%p517_p4)
}
 0x33a   :  { %411 = dma.vmem_to_hbm [thread:$0]  %s409_s0, 128, %s752_s9, [#allocation3]  }
 0x33b   :  { %529 = dma.done.wait [#allocation3], 128  }
 0x33c   :  { %530 = vsyncadd [#allocation3], 4294967168 }
 0x33d   :  { %415 = vsyncpa [#allocation3], 1 }

</bundles_post_ra>
